<compile_context>
chip_gen: v7x
topology: tpu7x:2x2x1
jax: 0.10.0
libtpu: 0.0.40
codegen_flags: <defaults>
</compile_context>

<pallas_src>
import jax
import jax.numpy as jnp
from jax.experimental import pallas as pl
from jax.experimental.pallas import tpu as pltpu

_MAX_DMA_CHUNKS = 8              # at most 8 concurrent HBM->HBM DMAs
_MIN_CHUNK_BYTES = 512 * 1024    # don't split below ~512 KiB per DMA


def _make_hbm_copy_kernel(chunks, n_rows):
    """Kernel factory: copy x -> o with chunked, overlapped HBM->HBM DMAs."""

    def kernel(x_hbm, o_hbm, sems):
        copies = []
        for k, (start, size) in enumerate(chunks):
            if len(chunks) == 1 and size == n_rows:
                src, dst = x_hbm, o_hbm                      # whole-array DMA
            else:
                src = x_hbm.at[pl.ds(start, size)]
                dst = o_hbm.at[pl.ds(start, size)]
            copies.append(pltpu.make_async_copy(src, dst, sems.at[k]))
        # Overlap: start every DMA before waiting on any of them.
        for cp in copies:
            cp.start()
        for cp in copies:
            cp.wait()

    return kernel


def inner_cos_tmp_forward(in_data: jax.Array, *, as_kernel: bool = True) -> jax.Array:
    """Pallas equivalent of InnerCos_tmp.forward (an identity).

    `self.bs, self.c` are static shape metadata and `self.output = in_data`
    carries no compute.  With as_kernel=False the input is returned directly
    (zero HBM traffic -- the optimal form).  With as_kernel=True (default) a
    single Pallas kernel performs the copy via chunked HBM->HBM DMAs.
    """
    # Static bookkeeping equivalent of `self.bs, self.c, _, _ = in_data.size()`.
    if in_data.ndim >= 2:
        _bs, _c = in_data.shape[0], in_data.shape[1]

    if not as_kernel or in_data.size == 0 or in_data.ndim == 0:
        return in_data

    orig_shape = in_data.shape

    # Merge the major dims so the chunker has a long leading axis; the two
    # minor dims are untouched, so this reshape is layout-preserving.
    if in_data.ndim >= 3:
        x = in_data.reshape((-1,) + in_data.shape[-2:])
    else:
        x = in_data
    rows = x.shape[0]

    itemsize = jnp.dtype(in_data.dtype).itemsize
    total_bytes = in_data.size * itemsize
    n_chunks = int(min(_MAX_DMA_CHUNKS, rows,
                       max(1, total_bytes // _MIN_CHUNK_BYTES)))

    base, rem = divmod(rows, n_chunks)
    chunks, start = [], 0
    for k in range(n_chunks):
        size = base + (1 if k < rem else 0)
        chunks.append((start, size))
        start += size

    out = pl.pallas_call(
        _make_hbm_copy_kernel(tuple(chunks), rows),
        out_shape=jax.ShapeDtypeStruct(x.shape, x.dtype),
        in_specs=[pl.BlockSpec(memory_space=pl.ANY)],
        out_specs=pl.BlockSpec(memory_space=pl.ANY),
        scratch_shapes=[pltpu.SemaphoreType.DMA((n_chunks,))],
    )(x)

    return out.reshape(orig_shape)


if __name__ == "__main__":
    key = jax.random.PRNGKey(0)
    # Small NCHW feature map consistent with the module: batch=2, channels=4, 16x16.
    x = jax.random.normal(key, (2, 4, 16, 16), dtype=jnp.float32)

    y = inner_cos_tmp_forward(x)
    jax.block_until_ready(y)
    assert y.shape == x.shape and y.dtype == x.dtype
    assert bool(jnp.all(y == x))

    # Ragged element count (not a multiple of 128): same DMA path, no VMEM
    # or (8,128) constraints involved (fixes the old whole-array fallback).
    xr = jax.random.normal(jax.random.PRNGKey(1), (2, 3, 5, 7), dtype=jnp.float32)
    yr = inner_cos_tmp_forward(xr)
    jax.block_until_ready(yr)
    assert yr.shape == xr.shape and bool(jnp.all(yr == xr))

    # Mid-size tensor (4 MiB) exercising the multi-chunk overlapped-DMA path.
    xm = jax.random.normal(jax.random.PRNGKey(2), (8, 8, 128, 128), dtype=jnp.float32)
    ym = inner_cos_tmp_forward(xm)
    jax.block_until_ready(ym)
    assert ym.shape == xm.shape and bool(jnp.all(ym == xm))

    print("KERNEL_OK")
</pallas_src>

<mosaic_0001>
module attributes {stable_mosaic.version = 11 : i64} {
  func.func @kernel(%arg0: memref<8x16x16xf32, #tpu.memory_space<any>>, %arg1: memref<8x16x16xf32, #tpu.memory_space<any>>, %arg2: memref<1x!tpu.dma_semaphore, #tpu.memory_space<semaphore_mem>>) attributes {dimension_semantics = [], scalar_prefetch = 0 : i64, scratch_operands = 1 : i64, tpu.core_type = #tpu.core_type<tc>} {
    %c0_i32 = arith.constant 0 : i32
    %0 = tpu.memref_slice %arg2[%c0_i32] : memref<1x!tpu.dma_semaphore, #tpu.memory_space<semaphore_mem>> -> memref<1x!tpu.dma_semaphore, #tpu.memory_space<semaphore_mem>>
    %1 = tpu.memref_squeeze %0 : memref<1x!tpu.dma_semaphore, #tpu.memory_space<semaphore_mem>> -> memref<!tpu.dma_semaphore, #tpu.memory_space<semaphore_mem>>
    tpu.enqueue_dma source(%arg0 : memref<8x16x16xf32, #tpu.memory_space<any>>) target(%arg1 : memref<8x16x16xf32, #tpu.memory_space<any>>) target_semaphore(%1 : memref<!tpu.dma_semaphore, #tpu.memory_space<semaphore_mem>>)
    %c0_i32_0 = arith.constant 0 : i32
    %2 = tpu.memref_slice %arg2[%c0_i32_0] : memref<1x!tpu.dma_semaphore, #tpu.memory_space<semaphore_mem>> -> memref<1x!tpu.dma_semaphore, #tpu.memory_space<semaphore_mem>>
    %3 = tpu.memref_squeeze %2 : memref<1x!tpu.dma_semaphore, #tpu.memory_space<semaphore_mem>> -> memref<!tpu.dma_semaphore, #tpu.memory_space<semaphore_mem>>
    tpu.wait_dma2 semaphore(%3 : memref<!tpu.dma_semaphore, #tpu.memory_space<semaphore_mem>>) src(%arg0 : memref<8x16x16xf32, #tpu.memory_space<any>>) dst(%arg1 : memref<8x16x16xf32, #tpu.memory_space<any>>)
    return
  }
}

</mosaic_0001>

<bundles_post_ra>
// kernel: tpu_custom_call.1
= control target key start
LH: loop header
LB: loop body
LE: loop exit
PB: predicated region body
PF: predicated region fallthrough
CT: control target
= control target key end

     0   :  { %s35_s6 = smov [#allocation2]   ;;  %s36_s7 = smov [#allocation3]   ;;  %s54_s0 = inlined_call_operand.hbm [shape: f32[8,16,16], index: 0, kind: input, shape index: {}]   ;;  %s55_s1 = inlined_call_operand.hbm [shape: f32[8,16,16], index: 1, kind: output, shape index: {}]  }
   0x1   :  { %s37_s8 = smov 0  }
   0x2   :  { %18 = dma.general %s54_s0, 2048, %s55_s1, %s35_s6, %s36_s7, [#allocation4], %s37_s8, 0  }
   0x3   :  { %33 = dma.done.wait [#allocation2], 2048 }
   0x4   :  { %34 = vsyncadd [#allocation2], 4294965248 }
   0x5   :  { %23 = vsyncmov [#allocation2] }
   0x8   :  { %s24_s13 = vpop.sfrf %23 }
   0x9   :  { %p29_p0 = scmp.ne.s32.totalorder %s24_s13, 0 }
   0xb   :  { %28 = shalt.err (%p29_p0)  }

</bundles_post_ra>
